<compile_context>
chip_gen: v6e
topology: v6e:2x2x1
jax: 0.10.0
libtpu: 0.0.40
codegen_flags: <defaults>
</compile_context>

<pallas_src>
import functools
import math

import jax
import jax.numpy as jnp
from jax import lax
from jax.experimental import pallas as pl
from jax.experimental.pallas import tpu as pltpu


def _round_up(x, m):
    return ((x + m - 1) // m) * m


def _actor_kernel(x_ref, w1_ref, b1_ref, w2_ref, b2_ref, wh_ref, bh_ref,
                  out_ref, *, max_log_std, d_out):
    # hidden1 + ReLU  (bf16 MXU operands, f32 accumulation)
    h1 = jnp.dot(x_ref[...], w1_ref[...], preferred_element_type=jnp.float32)
    h1 = jnp.maximum(h1 + b1_ref[...], 0.0)                          # (TB, hid) f32

    # hidden2 + ReLU
    h2 = jnp.dot(h1.astype(w2_ref.dtype), w2_ref[...],
                 preferred_element_type=jnp.float32)
    h2 = jnp.maximum(h2 + b2_ref[...], 0.0)                          # (TB, hid) f32

    # Fused mean|log_std head: one lane-dense (TB, 128) matmul + bias.
    head = jnp.dot(h2.astype(wh_ref.dtype), wh_ref[...],
                   preferred_element_type=jnp.float32) + bh_ref[...]

    # lanes [0, d_out)    -> mean (stored raw)
    # lanes [d_out, ...)  -> std = exp(clamp(log_std, -max, max))
    #                        (padding lanes beyond 2*d_out give exp(0)=1 and are
    #                         discarded by the wrapper slice)
    lane = lax.broadcasted_iota(jnp.int32, head.shape, 1)
    std_vals = jnp.exp(jnp.clip(head, -max_log_std, max_log_std))
    out_ref[...] = jnp.where(lane >= d_out, std_vals, head).astype(out_ref.dtype)


def prepare_params(params):
    """One-time packing / padding / bf16 casting of the weights (hoisted out of the
    per-call path).  Returns a dict of device arrays + static dims."""
    d_in, hid = params["w1"].shape
    d_out = params["wm"].shape[1]
    # Lane-dense combined head width (>= 128 lanes): [mean | log_std | zero pad].
    w_out = max(128, _round_up(2 * d_out, 128))

    wh = jnp.zeros((hid, w_out), jnp.float32)
    wh = wh.at[:, :d_out].set(params["wm"]).at[:, d_out:2 * d_out].set(params["ws"])
    bh = jnp.zeros((1, w_out), jnp.float32)
    bh = bh.at[:, :d_out].set(params["bm"]).at[:, d_out:2 * d_out].set(params["bs"])

    prep = {
        "w1": params["w1"].astype(jnp.bfloat16),   # (d_in, hid) — no K padding
        "b1": params["b1"].astype(jnp.float32),
        "w2": params["w2"].astype(jnp.bfloat16),
        "b2": params["b2"].astype(jnp.float32),
        "wh": wh.astype(jnp.bfloat16),
        "bh": bh,
        "d_in": int(d_in), "hid": int(hid), "d_out": int(d_out), "w_out": int(w_out),
    }
    return prep


def actor_critic_act_dist(prep, x, max_log_std):
    """Returns the packed (B, 2*d_out) bf16 slab: [:, :d_out]=mean, [:, d_out:]=std.
    Split lazily in the caller (single slice of the kernel output)."""
    B = x.shape[0]
    x2d = x.reshape(B, -1)                         # reshape(len,1,-1) then [:,0,:]
    d_in, hid = prep["d_in"], prep["hid"]
    d_out, w_out = prep["d_out"], prep["w_out"]
    assert x2d.shape[1] == d_in

    # Batch tiling: small batches -> single tile (16-row multiple: bf16 sublane
    # packing); large batches -> up to 1024-row tiles with >= 2 'parallel' grid
    # steps so v7x's two TensorCores are both used.
    if B <= 256:
        tb = max(16, _round_up(B, 16))
        b_pad = tb
    else:
        tb = min(1024, _round_up((B + 1) // 2, 128))
        b_pad = _round_up(B, tb)
    grid = (b_pad // tb,)

    # Single cast of the activations; pad batch rows only if needed.
    x_bf = x2d.astype(jnp.bfloat16)
    if b_pad != B:
        x_bf = jnp.zeros((b_pad, d_in), jnp.bfloat16).at[:B, :].set(x_bf)

    kernel = functools.partial(_actor_kernel,
                               max_log_std=float(max_log_std),
                               d_out=d_out)

    out = pl.pallas_call(
        kernel,
        out_shape=jax.ShapeDtypeStruct((b_pad, w_out), jnp.bfloat16),
        grid=grid,
        in_specs=[
            pl.BlockSpec((tb, d_in), lambda i: (i, 0)),      # x tile (pipelined)
            pl.BlockSpec((d_in, hid), lambda i: (0, 0)),     # w1 (VMEM resident)
            pl.BlockSpec((1, hid), lambda i: (0, 0)),        # b1
            pl.BlockSpec((hid, hid), lambda i: (0, 0)),      # w2 (VMEM resident)
            pl.BlockSpec((1, hid), lambda i: (0, 0)),        # b2
            pl.BlockSpec((hid, w_out), lambda i: (0, 0)),    # fused head weight
            pl.BlockSpec((1, w_out), lambda i: (0, 0)),      # fused head bias
        ],
        out_specs=pl.BlockSpec((tb, w_out), lambda i: (i, 0)),
        compiler_params=pltpu.CompilerParams(
            dimension_semantics=("parallel",)),
    )(x_bf, prep["w1"], prep["b1"], prep["w2"], prep["b2"], prep["wh"], prep["bh"])

    return out[:B, :2 * d_out]


def init_params(key, input_size, output_size, hidden=256,
                b_init_value=0.0, init_w=0.003):
    """Deterministic parameter init mirroring the PyTorch __init__ (fanin_init etc.).
    Weights stored transposed: (D_in, D_out)."""
    k1, k2, k3, k4, k5 = jax.random.split(key, 5)

    def fanin_uniform(k, fan_in, fan_out):
        bound = 1.0 / math.sqrt(fan_in)
        return jax.random.uniform(k, (fan_in, fan_out), jnp.float32, -bound, bound)

    return {
        "w1": fanin_uniform(k1, input_size, hidden),
        "b1": jnp.full((1, hidden), b_init_value, jnp.float32),
        "w2": fanin_uniform(k2, hidden, hidden),
        "b2": jnp.full((1, hidden), b_init_value, jnp.float32),
        "wm": jax.random.uniform(k3, (hidden, output_size), jnp.float32,
                                 -init_w, init_w),
        "bm": jnp.zeros((1, output_size), jnp.float32),
        "ws": jax.random.uniform(k4, (hidden, output_size), jnp.float32,
                                 -init_w / 3, init_w / 3),
        "bs": jax.random.uniform(k5, (1, output_size), jnp.float32,
                                 -init_w / 3, init_w / 3),
    }


def _reference(params, x, max_log_std):
    # pure-JAX f32 reference of act_dist's (mean, std)
    x2d = x.reshape(x.shape[0], -1).astype(jnp.float32)
    h1 = jax.nn.relu(x2d @ params["w1"] + params["b1"])
    h2 = jax.nn.relu(h1 @ params["w2"] + params["b2"])
    mean = h2 @ params["wm"] + params["bm"]
    log_std = jnp.clip(h2 @ params["ws"] + params["bs"], -max_log_std, max_log_std)
    return mean, jnp.exp(log_std)


if __name__ == "__main__":
    key = jax.random.PRNGKey(0)
    kp, kx = jax.random.split(key)

    batch = 8
    input_size = 32
    output_size = 8
    max_log_std = 2.0   # NOTE: spec clamps symmetrically to (-max, +max)

    params = init_params(kp, input_size, output_size)
    prep = prepare_params(params)                       # one-time (not in hot path)
    x = jax.random.normal(kx, (batch, input_size), jnp.float32)

    packed = actor_critic_act_dist(prep, x, max_log_std)
    jax.block_until_ready(packed)

    # Split the packed slab once (lazy split in the caller).
    mean = packed[:, :output_size].astype(jnp.float32)
    std = packed[:, output_size:2 * output_size].astype(jnp.float32)

    # Tolerance loosened vs f32: bf16 MXU operands + bf16 output slab (~1e-3 rel).
    ref_mean, ref_std = _reference(params, x, max_log_std)
    assert mean.shape == ref_mean.shape and std.shape == ref_std.shape
    assert jnp.allclose(mean, ref_mean, atol=2e-2, rtol=2e-2)
    assert jnp.allclose(std, ref_std, atol=2e-2, rtol=2e-2)

    # TODO(synk): TanhNormal sampling / evaluate() (MultivariateNormal log_prob,
    # entropy, self.critic / self.action_var) are stochastic or reference
    # undefined attributes and are not part of this kernel.

    print("KERNEL_OK")
</pallas_src>

<mosaic_0001>
module attributes {stable_mosaic.version = 11 : i64} {
  func.func @_actor_kernel(%arg0: i32, %arg1: memref<16x32xbf16, #tpu.memory_space<vmem>>, %arg2: memref<32x256xbf16, #tpu.memory_space<vmem>>, %arg3: memref<1x256xf32, #tpu.memory_space<vmem>>, %arg4: memref<256x256xbf16, #tpu.memory_space<vmem>>, %arg5: memref<1x256xf32, #tpu.memory_space<vmem>>, %arg6: memref<256x128xbf16, #tpu.memory_space<vmem>>, %arg7: memref<1x128xf32, #tpu.memory_space<vmem>>, %arg8: memref<16x128xbf16, #tpu.memory_space<vmem>>) attributes {dimension_semantics = [#tpu.dimension_semantics<parallel>], iteration_bounds = array<i64: 1>, scalar_prefetch = 0 : i64, scratch_operands = 0 : i64, tpu.core_type = #tpu.core_type<tc>, window_params = [{transform_indices = @transform_0, window_bounds = array<i64: 16, 32>}, {pipeline_mode = #tpu.pipeline_mode<synchronous>, transform_indices = @transform_1, window_bounds = array<i64: 32, 256>}, {pipeline_mode = #tpu.pipeline_mode<synchronous>, transform_indices = @transform_2, window_bounds = array<i64: 1, 256>}, {pipeline_mode = #tpu.pipeline_mode<synchronous>, transform_indices = @transform_3, window_bounds = array<i64: 256, 256>}, {pipeline_mode = #tpu.pipeline_mode<synchronous>, transform_indices = @transform_4, window_bounds = array<i64: 1, 256>}, {pipeline_mode = #tpu.pipeline_mode<synchronous>, transform_indices = @transform_5, window_bounds = array<i64: 256, 128>}, {pipeline_mode = #tpu.pipeline_mode<synchronous>, transform_indices = @transform_6, window_bounds = array<i64: 1, 128>}, {transform_indices = @transform_7, window_bounds = array<i64: 16, 128>}]} {
    %c0 = arith.constant 0 : index
    %c0_0 = arith.constant 0 : index
    %0 = vector.load %arg1[%c0, %c0_0] : memref<16x32xbf16, #tpu.memory_space<vmem>>, vector<16x32xbf16>
    %c0_1 = arith.constant 0 : index
    %c0_2 = arith.constant 0 : index
    %1 = vector.load %arg2[%c0_1, %c0_2] : memref<32x256xbf16, #tpu.memory_space<vmem>>, vector<32x256xbf16>
    %cst = arith.constant dense<0.000000e+00> : vector<16x256xf32>
    %2 = tpu.matmul %0, %1, %cst {dimension_numbers = #tpu.dot_dimension_numbers<[1], [0], [0], [1], [0, 0, 1, 1], [], []>} : vector<16x32xbf16>, vector<32x256xbf16>, vector<16x256xf32> -> vector<16x256xf32>
    %c0_3 = arith.constant 0 : index
    %c0_4 = arith.constant 0 : index
    %3 = vector.load %arg3[%c0_3, %c0_4] : memref<1x256xf32, #tpu.memory_space<vmem>>, vector<1x256xf32>
    %4 = vector.broadcast %3 : vector<1x256xf32> to vector<16x256xf32>
    %5 = arith.addf %2, %4 : vector<16x256xf32>
    %cst_5 = arith.constant 0.000000e+00 : f32
    %6 = vector.broadcast %cst_5 : f32 to vector<16x256xf32>
    %7 = arith.maximumf %5, %6 : vector<16x256xf32>
    %8 = arith.truncf %7 : vector<16x256xf32> to vector<16x256xbf16>
    %c0_6 = arith.constant 0 : index
    %c0_7 = arith.constant 0 : index
    %9 = vector.load %arg4[%c0_6, %c0_7] : memref<256x256xbf16, #tpu.memory_space<vmem>>, vector<256x256xbf16>
    %cst_8 = arith.constant dense<0.000000e+00> : vector<16x256xf32>
    %10 = tpu.matmul %8, %9, %cst_8 {dimension_numbers = #tpu.dot_dimension_numbers<[1], [0], [0], [1], [0, 0, 1, 1], [], []>} : vector<16x256xbf16>, vector<256x256xbf16>, vector<16x256xf32> -> vector<16x256xf32>
    %c0_9 = arith.constant 0 : index
    %c0_10 = arith.constant 0 : index
    %11 = vector.load %arg5[%c0_9, %c0_10] : memref<1x256xf32, #tpu.memory_space<vmem>>, vector<1x256xf32>
    %12 = vector.broadcast %11 : vector<1x256xf32> to vector<16x256xf32>
    %13 = arith.addf %10, %12 : vector<16x256xf32>
    %cst_11 = arith.constant 0.000000e+00 : f32
    %14 = vector.broadcast %cst_11 : f32 to vector<16x256xf32>
    %15 = arith.maximumf %13, %14 : vector<16x256xf32>
    %16 = arith.truncf %15 : vector<16x256xf32> to vector<16x256xbf16>
    %c0_12 = arith.constant 0 : index
    %c0_13 = arith.constant 0 : index
    %17 = vector.load %arg6[%c0_12, %c0_13] : memref<256x128xbf16, #tpu.memory_space<vmem>>, vector<256x128xbf16>
    %cst_14 = arith.constant dense<0.000000e+00> : vector<16x128xf32>
    %18 = tpu.matmul %16, %17, %cst_14 {dimension_numbers = #tpu.dot_dimension_numbers<[1], [0], [0], [1], [0, 0, 1, 1], [], []>} : vector<16x256xbf16>, vector<256x128xbf16>, vector<16x128xf32> -> vector<16x128xf32>
    %c0_15 = arith.constant 0 : index
    %c0_16 = arith.constant 0 : index
    %19 = vector.load %arg7[%c0_15, %c0_16] : memref<1x128xf32, #tpu.memory_space<vmem>>, vector<1x128xf32>
    %20 = vector.broadcast %19 : vector<1x128xf32> to vector<16x128xf32>
    %21 = arith.addf %18, %20 : vector<16x128xf32>
    %22 = tpu.iota {dimensions = array<i32: 1>} : vector<16x128xi32>
    %cst_17 = arith.constant -2.000000e+00 : f32
    %cst_18 = arith.constant 2.000000e+00 : f32
    %23 = vector.broadcast %cst_17 : f32 to vector<16x128xf32>
    %24 = arith.maximumf %23, %21 : vector<16x128xf32>
    %25 = vector.broadcast %cst_18 : f32 to vector<16x128xf32>
    %26 = arith.minimumf %25, %24 : vector<16x128xf32>
    %27 = math.exp %26 : vector<16x128xf32>
    %c8_i32 = arith.constant 8 : i32
    %28 = vector.broadcast %c8_i32 : i32 to vector<16x128xi32>
    %29 = arith.cmpi sge, %22, %28 : vector<16x128xi32>
    %30 = arith.select %29, %27, %21 : vector<16x128xi1>, vector<16x128xf32>
    %31 = arith.truncf %30 : vector<16x128xf32> to vector<16x128xbf16>
    %c0_19 = arith.constant 0 : index
    %c0_20 = arith.constant 0 : index
    %32 = vector.load %arg8[%c0_19, %c0_20] : memref<16x128xbf16, #tpu.memory_space<vmem>>, vector<16x128xbf16>
    tpu.vector_store %arg8[%c0_19, %c0_20], %31 {strides = array<i32>} : memref<16x128xbf16, #tpu.memory_space<vmem>>, vector<16x128xbf16>,
    return
  }
  func.func @transform_0(%arg0: i32) -> (i32, i32) {
    %c0_i32 = arith.constant 0 : i32
    %c0_i32_0 = arith.constant 0 : i32
    return %arg0, %c0_i32 : i32, i32
  }
  func.func @transform_1(%arg0: i32) -> (i32, i32) {
    %c0_i32 = arith.constant 0 : i32
    %c0_i32_0 = arith.constant 0 : i32
    %c0_i32_1 = arith.constant 0 : i32
    return %c0_i32, %c0_i32_0 : i32, i32
  }
  func.func @transform_2(%arg0: i32) -> (i32, i32) {
    %c0_i32 = arith.constant 0 : i32
    %c0_i32_0 = arith.constant 0 : i32
    %c0_i32_1 = arith.constant 0 : i32
    return %c0_i32, %c0_i32_0 : i32, i32
  }
  func.func @transform_3(%arg0: i32) -> (i32, i32) {
    %c0_i32 = arith.constant 0 : i32
    %c0_i32_0 = arith.constant 0 : i32
    %c0_i32_1 = arith.constant 0 : i32
    return %c0_i32, %c0_i32_0 : i32, i32
  }
  func.func @transform_4(%arg0: i32) -> (i32, i32) {
    %c0_i32 = arith.constant 0 : i32
    %c0_i32_0 = arith.constant 0 : i32
    %c0_i32_1 = arith.constant 0 : i32
    return %c0_i32, %c0_i32_0 : i32, i32
  }
  func.func @transform_5(%arg0: i32) -> (i32, i32) {
    %c0_i32 = arith.constant 0 : i32
    %c0_i32_0 = arith.constant 0 : i32
    %c0_i32_1 = arith.constant 0 : i32
    return %c0_i32, %c0_i32_0 : i32, i32
  }
  func.func @transform_6(%arg0: i32) -> (i32, i32) {
    %c0_i32 = arith.constant 0 : i32
    %c0_i32_0 = arith.constant 0 : i32
    %c0_i32_1 = arith.constant 0 : i32
    return %c0_i32, %c0_i32_0 : i32, i32
  }
  func.func @transform_7(%arg0: i32) -> (i32, i32) {
    %c0_i32 = arith.constant 0 : i32
    %c0_i32_0 = arith.constant 0 : i32
    return %arg0, %c0_i32 : i32, i32
  }
}

</mosaic_0001>

<bundles_post_ra>
// kernel: tpu_custom_call.1
= control target key start
LH: loop header
LB: loop body
LE: loop exit
PB: predicated region body
PF: predicated region fallthrough
CT: control target
= control target key end

     0   :  { %12 = vsyncpa [#allocation3], 0  ;;  %s1022_s0 = inlined_call_operand.hbm [shape: bf16[16,32], index: 0, kind: input, shape index: {}]   ;;  %s1023_s1 = inlined_call_operand.hbm [shape: bf16[32,256], index: 1, kind: input, shape index: {}]   ;;  %s1024_s2 = inlined_call_operand.vmem [shape: f32[1,256], index: 2, kind: input, shape index: {}]   ;;  %s1025_s3 = inlined_call_operand.hbm [shape: bf16[256,256], index: 3, kind: input, shape index: {}]   ;;  %s1026_s4 = inlined_call_operand.vmem [shape: f32[1,256], index: 4, kind: input, shape index: {}]   ;;  %s1027_s5 = inlined_call_operand.hbm [shape: bf16[256,128], index: 5, kind: input, shape index: {}]   ;;  %s1028_s6 = inlined_call_operand.vmem [shape: f32[1,128], index: 6, kind: input, shape index: {}]   ;;  %s1029_s7 = inlined_call_operand.hbm [shape: bf16[16,128], index: 7, kind: output, shape index: {}]  }
   0x1   :  { %13 = vsyncpa [#allocation6], 0 }
   0x2   :  { %14 = vsyncpa [#allocation9], 0 }
   0x3   :  { %15 = vsyncpa [#allocation4], 0  ;;  %s931_s24 = smov [#allocation5]  }
   0x4   :  { %s33_s25 = sshll.u32 %s931_s24, 4  ;;  %s34_s25 = int_to_ptr.vmem [resolvable:$true] %s33_s25 }
   0x5   :  { %s831_s26 = scalar_lea.vmem %s34_s25, 512  ;;  %p836_p1 = scmp.lt.s32.totalorder %s34_s25, %s34_s25 }
   0x6   :  { %p832_p0 = scmp.ne.s32.totalorder %s34_s25, %s831_s26  ;;  %p837_p2 = scmp.lt.s32.totalorder %s831_s26, %s831_s26 }
   0x8   :  { %p838_p3 = por %p837_p2, %p836_p1 }
   0xa   :  { %p839_p4 = pnand %p838_p3, %p832_p0 }
   0xc   :  { %842 = shalt.err (!%p839_p4)
}
   0xd   :  { %s932_s27 = smov 128   ;;  %s933_s28 = smov 8  }
   0xe   :  { %39 = dma.hbm_to_vmem [thread:$0]  %s1023_s1, 512, %s34_s25, [#allocation6], %s932_s27, %s932_s27, %s933_s28  }
   0xf   :  { %s934_s8 = smov [#allocation2]  }
  0x10   :  { %s21_s9 = sshll.u32 %s934_s8, 4  ;;  %s22_s9 = int_to_ptr.vmem [resolvable:$true] %s21_s9 }
  0x11   :  { %s851_s10 = scalar_lea.vmem %s22_s9, 128  ;;  %p856_p6 = scmp.lt.s32.totalorder %s22_s9, %s22_s9 }
  0x12   :  { %p852_p5 = scmp.ne.s32.totalorder %s22_s9, %s851_s10  ;;  %p857_p7 = scmp.lt.s32.totalorder %s851_s10, %s851_s10 }
  0x14   :  { %p858_p8 = por %p857_p7, %p856_p6 }
  0x16   :  { %p859_p9 = pnand %p858_p8, %p852_p5 }
  0x18   :  { %862 = shalt.err (!%p859_p9)
}
  0x19   :  { %s935_s11 = smov 64   ;;  %s936_s12 = smov 4  }
  0x1a   :  { %27 = dma.hbm_to_vmem [thread:$0]  %s1022_s0, 128, %s22_s9, [#allocation3], %s935_s11, %s935_s11, %s936_s12  }
  0x1b   :  { %s937_s1 = smov [#allocation7]   ;;  %s938_s16 = smov [#allocation8]  }
  0x1c   :  { %s47_s15 = sshll.u32 %s937_s1, 4  ;;  %s61_s17 = sshll.u32 %s938_s16, 4  ;;  %s48_s15 = int_to_ptr.vmem [resolvable:$true] %s47_s15  ;;  %s62_s17 = int_to_ptr.vmem [resolvable:$true] %s61_s17 }
  0x1d   :  { %s871_s18 = scalar_lea.vmem %s48_s15, 4096  ;;  %p876_p11 = scmp.lt.s32.totalorder %s48_s15, %s48_s15 }
  0x1e   :  { %p872_p10 = scmp.ne.s32.totalorder %s48_s15, %s871_s18  ;;  %p877_p12 = scmp.lt.s32.totalorder %s871_s18, %s871_s18 }
  0x20   :  { %p878_p13 = por %p877_p12, %p876_p11 }
  0x22   :  { %p879_p0 = pnand %p878_p13, %p872_p10 }
  0x24   :  { %882 = shalt.err (!%p879_p0)
}
  0x25   :  { %53 = dma.hbm_to_vmem [thread:$0]  %s1025_s3, 4096, %s48_s15, [#allocation6], %s932_s27, %s932_s27, %s933_s28  }
  0x26   :  { %s891_s0 = scalar_lea.vmem %s62_s17, 2048  ;;  %p896_p2 = scmp.lt.s32.totalorder %s62_s17, %s62_s17 }
  0x27   :  { %p892_p1 = scmp.ne.s32.totalorder %s62_s17, %s891_s0  ;;  %p897_p3 = scmp.lt.s32.totalorder %s891_s0, %s891_s0 }
  0x29   :  { %p898_p4 = por %p897_p3, %p896_p2 }
  0x2b   :  { %p899_p5 = pnand %p898_p4, %p892_p1 }
  0x2d   :  { %902 = shalt.err (!%p899_p5)
}
  0x2e   :  { %67 = dma.hbm_to_vmem [thread:$0]  %s1027_s5, 2048, %s62_s17, [#allocation9], %s935_s11, %s935_s11, %s936_s12  }
  0x2f   :  { %923 = dma.done.wait [#allocation3], 128  }
  0x30   :  { %924 = vsyncadd [#allocation3], 4294967168 }
  0x31   :  { %925 = dma.done.wait [#allocation6], 4608  }
  0x32   :  { %926 = vsyncadd [#allocation6], 4294962688 }
  0x33   :  { %927 = dma.done.wait [#allocation9], 2048  }
  0x34   :  { %928 = vsyncadd [#allocation9], 4294965248  ;;  %v939_v0 = vmov 0   ;;  %v748_v1 = vld [vmem:[#allocation5 + $0x14] ss:$8 sps:$4 sm:$0xff]   ;;  %vm126_vm0 = vcmask 261120   ;;  %v91_v48 = vlaneseq }
  0x35   :  { %162 = vmatprep.mubr.bf16.mxu0 %v939_v0  ;;  %v750_v2 = vld [vmem:[#allocation5 + $0x10] ss:$8 sps:$4 sm:$0xff]   ;;  %142 = vmatprep.subr.bf16.mxu0 %v748_v1  ;;  %v751_v3 = vld [vmem:[#allocation5 + $0x4] ss:$8 sps:$4 sm:$0xff]   ;;  %v753_v4 = vld [vmem:[#allocation5] ss:$8 sps:$4 sm:$0xff]  }
  0x36   :  { %143 = vmatpush1.bf16.msra.mxu0 %v750_v2  ;;  %v755_v5 = vld [vmem:[#allocation7 + $0x74] ss:$8 sps:$4 sm:$0xff]   ;;  %v757_v6 = vld [vmem:[#allocation7 + $0x70] ss:$8 sps:$4 sm:$0xff]   ;;  %v758_v7 = vld [vmem:[#allocation7 + $0x64] ss:$8 sps:$4 sm:$0xff]  }
  0x37   :  { %144 = vmatprep.subr.bf16.mxu0 %v751_v3  ;;  %v754_v8 = vld [vmem:[#allocation2] sm:$0xff]   ;;  %383 = vmatprep.subr.bf16.mxu1 %v755_v5  ;;  %v760_v9 = vld [vmem:[#allocation7 + $0x60] ss:$8 sps:$4 sm:$0xff]   ;;  %v764_v12 = vld [vmem:[#allocation7 + $0x44] ss:$8 sps:$4 sm:$0xff]   ;;  %v92_v49 = vshrl.u32 %v91_v48, 7 }
  0x38   :  { %384 = vmatpush1.bf16.msra.mxu1 %v757_v6  ;;  %v761_v10 = vld [vmem:[#allocation7 + $0x54] ss:$8 sps:$4 sm:$0xff]   ;;  %v763_v11 = vld [vmem:[#allocation7 + $0x50] ss:$8 sps:$4 sm:$0xff]   ;;  %v766_v13 = vld [vmem:[#allocation7 + $0x40] ss:$8 sps:$4 sm:$0xff]  }
  0x39   :  { %385 = vmatprep.subr.bf16.mxu1 %v758_v7  ;;  %v767_v14 = vld [vmem:[#allocation7 + $0x34] ss:$8 sps:$4 sm:$0xff]   ;;  %v769_v15 = vld [vmem:[#allocation7 + $0x30] ss:$8 sps:$4 sm:$0xff]   ;;  %v770_v16 = vld [vmem:[#allocation7 + $0x24] ss:$8 sps:$4 sm:$0xff]  }
  0x3a   :  { %145 = vmatpush1.bf16.msra.mxu0 %v753_v4  ;;  %v772_v17 = vld [vmem:[#allocation7 + $0x20] ss:$8 sps:$4 sm:$0xff]   ;;  %v773_v18 = vld [vmem:[#allocation7 + $0x14] ss:$8 sps:$4 sm:$0xff]   ;;  %v775_v19 = vld [vmem:[#allocation7 + $0x10] ss:$8 sps:$4 sm:$0xff]  }
  0x3b   :  { %v776_v20 = vld [vmem:[#allocation7 + $0x4] ss:$8 sps:$4 sm:$0xff]   ;;  %v778_v21 = vld [vmem:[#allocation7] ss:$8 sps:$4 sm:$0xff]   ;;  %v779_v22 = vld [vmem:[#allocation7 + $0xf4] ss:$8 sps:$4 sm:$0xff]  }
  0x3c   :  { %386 = vmatpush1.bf16.msra.mxu1 %v760_v9  ;;  %v781_v23 = vld [vmem:[#allocation7 + $0xf0] ss:$8 sps:$4 sm:$0xff]   ;;  %v782_v24 = vld [vmem:[#allocation7 + $0xe4] ss:$8 sps:$4 sm:$0xff]   ;;  %v784_v25 = vld [vmem:[#allocation7 + $0xe0] ss:$8 sps:$4 sm:$0xff]  }
  0x3d   :  { %655 = vmatmul.mubr.msk.bf16.vlgmr.msra.gmra.mxu0 %vm126_vm0, %v754_v8  ;;  %387 = vmatprep.subr.bf16.mxu1 %v761_v10  ;;  %v785_v26 = vld [vmem:[#allocation7 + $0xd4] ss:$8 sps:$4 sm:$0xff]   ;;  %v787_v27 = vld [vmem:[#allocation7 + $0xd0] ss:$8 sps:$4 sm:$0xff]   ;;  %v788_v28 = vld [vmem:[#allocation7 + $0xc4] ss:$8 sps:$4 sm:$0xff]  }
  0x3e   :  { %v790_v29 = vld [vmem:[#allocation7 + $0xc0] ss:$8 sps:$4 sm:$0xff]   ;;  %v791_v30 = vld [vmem:[#allocation7 + $0xb4] ss:$8 sps:$4 sm:$0xff]   ;;  %v793_v31 = vld [vmem:[#allocation7 + $0xb0] ss:$8 sps:$4 sm:$0xff]  }
  0x3f   :  { %v794_v32 = vld [vmem:[#allocation7 + $0xa4] ss:$8 sps:$4 sm:$0xff]   ;;  %v796_v33 = vld [vmem:[#allocation7 + $0xa0] ss:$8 sps:$4 sm:$0xff]   ;;  %v797_v34 = vld [vmem:[#allocation7 + $0x94] ss:$8 sps:$4 sm:$0xff]  }
  0x40   :  { %388 = vmatpush1.bf16.msra.mxu1 %v763_v11  ;;  %v799_v35 = vld [vmem:[#allocation7 + $0x90] ss:$8 sps:$4 sm:$0xff]   ;;  %v800_v36 = vld [vmem:[#allocation7 + $0x84] ss:$8 sps:$4 sm:$0xff]   ;;  %v802_v37 = vld [vmem:[#allocation7 + $0x80] ss:$8 sps:$4 sm:$0xff]  }
  0x41   :  { %389 = vmatprep.subr.bf16.mxu1 %v764_v12  ;;  %v803_v38 = vld [vmem:[#allocation8 + $0x78] sm:$0xff]   ;;  %v805_v40 = vld [vmem:[#allocation8 + $0x70] sm:$0xff]   ;;  %v807_v42 = vld [vmem:[#allocation8 + $0x68] sm:$0xff]   ;;  %v97_v50 = vsub.s32 1, %v92_v49  ;;  %v93_v51 = vsub.s32 0, %v92_v49  ;;  %s940_s25 = smov [#allocation10]  }
  0x42   :  { %v804_v39 = vld [vmem:[#allocation8 + $0x38] sm:$0xff]   ;;  %716 = vmatprep.subr.bf16.mxu0 %v803_v38  ;;  %v806_v41 = vld [vmem:[#allocation8 + $0x30] sm:$0xff]   ;;  %v808_v43 = vld [vmem:[#allocation8 + $0x28] sm:$0xff]   ;;  %s636_s26 = sshll.u32 %s940_s25, 4  ;;  %s637_s26 = int_to_ptr.vmem [resolvable:$true] %s636_s26 }
  0x43   :  { %717 = vmatpush3.bf16.msra.mxu0 %v804_v39  ;;  %v809_v44 = vld [vmem:[#allocation8 + $0x60] sm:$0xff]   ;;  %v811_v46 = vld [vmem:[#allocation8 + $0x58] sm:$0xff]   ;;  %v813_v5 = vld [vmem:[#allocation8 + $0x50] sm:$0xff]   ;;  %p908_p7 = scmp.lt.s32.totalorder %s637_s26, %s637_s26 }
  0x44   :  { %390 = vmatpush1.bf16.msra.mxu1 %v766_v13  ;;  %718 = vmatprep.subr.bf16.mxu0 %v805_v40  ;;  %v810_v45 = vld [vmem:[#allocation8 + $0x20] sm:$0xff]   ;;  %v812_v47 = vld [vmem:[#allocation8 + $0x18] sm:$0xff]   ;;  %v814_v6 = vld [vmem:[#allocation8 + $0x10] sm:$0xff]  }
  0x45   :  { %391 = vmatprep.subr.bf16.mxu1 %v767_v14  ;;  %v89_v52 = vld [vmem:[%s1024_s2] sm:$0x3]  ;;  %v815_v7 = vld [vmem:[#allocation8 + $0x48] sm:$0xff]   ;;  %v817_v9 = vld [vmem:[#allocation8 + $0x40] sm:$0xff]  }
  0x46   :  { %v98_v54 = vrot.slane %v89_v52, %v97_v50  ;;  %v94_v55 = vrot.slane %v89_v52, %v93_v51  ;;  %v816_v8 = vld [vmem:[#allocation8 + $0x8] sm:$0xff]   ;;  %v818_v10 = vld [vmem:[#allocation8] sm:$0xff]   ;;  %v211_v11 = vld [vmem:[%s1026_s4] sm:$0x3] }
  0x47   :  { %719 = vmatpush3.bf16.msra.mxu0 %v806_v41  ;;  %v220_v13 = vrot.slane %v211_v11, %v97_v50  ;;  %v216_v14 = vrot.slane %v211_v11, %v93_v51  ;;  %v609_v41 = vand.u32 127, %v91_v48 }
  0x48   :  { %392 = vmatpush1.bf16.msra.mxu1 %v769_v15  ;;  %720 = vmatprep.subr.bf16.mxu0 %v807_v42 }
  0x49   :  { %393 = vmatprep.subr.bf16.mxu1 %v770_v16  ;;  %vm618_vm1 = vcmp.ge.s32.totalorder %v609_v41, 8 }
  0x4b   :  { %721 = vmatpush3.bf16.msra.mxu0 %v808_v43 }
  0x4c   :  { %394 = vmatpush1.bf16.msra.mxu1 %v772_v17  ;;  %722 = vmatprep.subr.bf16.mxu0 %v809_v44 }
  0x4d   :  { %395 = vmatprep.subr.bf16.mxu1 %v773_v18 }
  0x4f   :  { %723 = vmatpush3.bf16.msra.mxu0 %v810_v45 }
  0x50   :  { %396 = vmatpush1.bf16.msra.mxu1 %v775_v19  ;;  %724 = vmatprep.subr.bf16.mxu0 %v811_v46 }
  0x51   :  { %397 = vmatprep.subr.bf16.mxu1 %v776_v20 }
  0x53   :  { %725 = vmatpush3.bf16.msra.mxu0 %v812_v47 }
  0x54   :  { %398 = vmatpush1.bf16.msra.mxu1 %v778_v21  ;;  %726 = vmatprep.subr.bf16.mxu0 %v813_v5 }
  0x55   :  { %399 = vmatprep.subr.bf16.mxu1 %v779_v22 }
  0x57   :  { %727 = vmatpush3.bf16.msra.mxu0 %v814_v6 }
  0x58   :  { %400 = vmatpush2.bf16.msra.mxu1 %v781_v23  ;;  %728 = vmatprep.subr.bf16.mxu0 %v815_v7 }
  0x59   :  { %401 = vmatprep.subr.bf16.mxu1 %v782_v24 }
  0x5b   :  { %729 = vmatpush3.bf16.msra.mxu0 %v816_v8 }
  0x5c   :  { %402 = vmatpush2.bf16.msra.mxu1 %v784_v25  ;;  %730 = vmatprep.subr.bf16.mxu0 %v817_v9 }
  0x5d   :  { %403 = vmatprep.subr.bf16.mxu1 %v785_v26 }
  0x5f   :  { %731 = vmatpush3.bf16.msra.mxu0 %v818_v10 }
  0x60   :  { %404 = vmatpush2.bf16.msra.mxu1 %v787_v27 }
  0x61   :  { %405 = vmatprep.subr.bf16.mxu1 %v788_v28 }
  0x64   :  { %406 = vmatpush2.bf16.msra.mxu1 %v790_v29  ;;  %v688_v29 = vld [vmem:[%s1028_s6] ss:$0 sm:$0xff]  ;;  %s903_s6 = scalar_lea.vmem %s637_s26, 128 }
  0x65   :  { %407 = vmatprep.subr.bf16.mxu1 %v791_v30  ;;  %p904_p6 = scmp.ne.s32.totalorder %s637_s26, %s903_s6  ;;  %p909_p8 = scmp.lt.s32.totalorder %s903_s6, %s903_s6 }
  0x67   :  { %p910_p9 = por %p909_p8, %p908_p7 }
  0x68   :  { %408 = vmatpush2.bf16.msra.mxu1 %v793_v31 }
  0x69   :  { %409 = vmatprep.subr.bf16.mxu1 %v794_v32  ;;  %p911_p10 = pnand %p910_p9, %p904_p6 }
  0x6c   :  { %410 = vmatpush2.bf16.msra.mxu1 %v796_v33 }
  0x6d   :  { %411 = vmatprep.subr.bf16.mxu1 %v797_v34 }
  0x70   :  { %412 = vmatpush2.bf16.msra.mxu1 %v799_v35 }
  0x71   :  { %413 = vmatprep.subr.bf16.mxu1 %v800_v36 }
  0x74   :  { %414 = vmatpush2.bf16.msra.mxu1 %v802_v37 }
  0xfd   :  { %v164_v53 = vpop.f32.mrf.mxu0 }
  0xfe   :  { %v165_v60 = vadd.f32 %v164_v53, %v94_v55 }
  0xff   :  { %v166_v56 = vpop.f32.mrf.mxu0 }
 0x100   :  { %v167_v58 = vadd.f32 %v166_v56, %v98_v54  ;;  %v173_v2 = vmax.f32 %v165_v60, 0.0 }
 0x101   :  { %v168_v57 = vpop.f32.mrf.mxu0 }
 0x102   :  { %v169_v59 = vadd.f32 %v168_v57, %v94_v55  ;;  %v174_v0 = vmax.f32 %v167_v58, 0.0 }
 0x103   :  { %v170_v61 = vpop.f32.mrf.mxu0 }
 0x104   :  { %v171_v62 = vadd.f32 %v170_v61, %v98_v54  ;;  %v175_v63 = vmax.f32 %v169_v59, 0.0 }
 0x106   :  { %v176_v1 = vmax.f32 %v171_v62, 0.0  ;;  %v177_v4 = vpack.c.bf16 %v175_v63, %v173_v2 }
 0x108   :  { %v178_v3 = vpack.c.bf16 %v176_v1, %v174_v0 }
 0x10a   :  { %415 = vmatprep.mubr.bf16.mxu1 %v178_v3 }
 0x10b   :  { %416 = vmatmul.mubr.bf16.vlgmr.msra.gmra.mxu1 %v177_v4 }
 0x1cb   :  { %v417_v12 = vpop.f32.mrf.mxu1 }
 0x1cc   :  { %v418_v19 = vadd.f32 %v417_v12, %v216_v14 }
 0x1cd   :  { %v419_v15 = vpop.f32.mrf.mxu1 }
 0x1ce   :  { %v420_v17 = vadd.f32 %v419_v15, %v220_v13  ;;  %v426_v25 = vmax.f32 %v418_v19, 0.0 }
 0x1cf   :  { %v421_v16 = vpop.f32.mrf.mxu1 }
 0x1d0   :  { %v422_v18 = vadd.f32 %v421_v16, %v216_v14  ;;  %v427_v23 = vmax.f32 %v420_v17, 0.0 }
 0x1d1   :  { %v423_v20 = vpop.f32.mrf.mxu1 }
 0x1d2   :  { %v424_v21 = vadd.f32 %v423_v20, %v220_v13  ;;  %v428_v22 = vmax.f32 %v422_v18, 0.0 }
 0x1d4   :  { %v429_v24 = vmax.f32 %v424_v21, 0.0  ;;  %v430_v27 = vpack.c.bf16 %v428_v22, %v426_v25 }
 0x1d6   :  { %v431_v26 = vpack.c.bf16 %v429_v24, %v427_v23 }
 0x1d8   :  { %599 = vmatprep.mubr.bf16.mxu0 %v431_v26 }
 0x1d9   :  { %600 = vmatmul.mubr.bf16.vlgmr.msra.gmra.mxu0 %v430_v27 }
 0x299   :  { %v732_v28 = vpop.f32.mrf.mxu0 }
 0x29b   :  { %v733_v30 = vpop.f32.mrf.mxu0 }
 0x29c   :  { %v734_v31 = vadd.f32 %v733_v30, %v732_v28 }
 0x29d   :  { %v735_v32 = vpop.f32.mrf.mxu0 }
 0x29e   :  { %v602_v33 = vadd.f32 %v734_v31, %v688_v29 }
 0x29f   :  { %v736_v34 = vpop.f32.mrf.mxu0 }
 0x2a0   :  { %v705_v35 = vclamps-f32 %v602_v33, 2.0  ;;  %v737_v36 = vadd.f32 %v736_v34, %v735_v32 }
 0x2a2   :  { %v614_v37 = vmul.f32 1.442695, %v705_v35  ;;  %v605_v38 = vadd.f32 %v737_v36, %v688_v29 }
 0x2a4   :  { %v706_v39 = vclamps-f32 %v605_v38, 2.0  ;;  %819 = vpow2.f32 %v614_v37 }
 0x2a6   :  { %v616_v40 = vmul.f32 1.442695, %v706_v39 }
 0x2a8   :  { %821 = vpow2.f32 %v616_v40 }
 0x2b1   :  { %v820_v42 = vpop.eup %819 }
 0x2b2   :  { %v619_v44 = vsel %vm618_vm1, %v820_v42, %v602_v33 }
 0x2b5   :  { %v822_v43 = vpop.eup %821 }
 0x2b6   :  { %v620_v45 = vsel %vm618_vm1, %v822_v43, %v605_v38 }
 0x2b7   :  { %v714_v46 = vpack.c.bf16 %v620_v45, %v619_v44 }
 0x2b9   :  { %715 = vst [vmem:[#allocation10] sm:$0xff] %v714_v46  }
 0x2ba   :  { %914 = shalt.err (!%p911_p10)
}
 0x2bb   :  { %642 = dma.vmem_to_hbm [thread:$0]  %s637_s26, 128, %s1029_s7, [#allocation4], %s935_s11, %s935_s11, %s936_s12  }
 0x2bc   :  { %929 = dma.done.wait [#allocation4], 128  }
 0x2bd   :  { %930 = vsyncadd [#allocation4], 4294967168 }
 0x2be   :  { %646 = vsyncpa [#allocation3], 1 }
 0x2bf   :  { %647 = vsyncpa [#allocation6], 1 }
 0x2c0   :  { %648 = vsyncpa [#allocation9], 1 }
 0x2c1   :  { %649 = vsyncpa [#allocation4], 1 }

</bundles_post_ra>
